<compile_context>
chip_gen: v7x
topology: tpu7x:2x2x1
jax: 0.10.0
libtpu: 0.0.40
codegen_flags: <defaults>
</compile_context>

<pallas_src>
import jax
import jax.numpy as jnp
from jax.experimental import pallas as pl
from jax.experimental.pallas import tpu as pltpu


def _ratenet_kernel(x_ref, w1_ref, t1_ref, w2_ref, t2_ref, w3_ref, b3_ref,
                    out_ref):
    # fc1: Linear (BN scale pre-folded into W1) + shift + ReLU.
    # x arrives as f32; cast to bf16 on the VPU, accumulate in f32 on the MXU.
    xb = x_ref[...].astype(jnp.bfloat16)
    z1 = jnp.dot(xb, w1_ref[...], preferred_element_type=jnp.float32)
    h1 = jnp.maximum(z1 + t1_ref[...], 0.0)                     # [TB, D/2] f32

    # fc2: same structure.
    z2 = jnp.dot(h1.astype(jnp.bfloat16), w2_ref[...],
                 preferred_element_type=jnp.float32)
    h2 = jnp.maximum(z2 + t2_ref[...], 0.0)                     # [TB, D/4] f32

    # get_score: Linear(D/4 -> 1) as VPU multiply + lane reduce (no N=1 matmul),
    # stored lane-dense as a (1, 1, TB) row (XLU relayout; XLU is idle here).
    score = jnp.sum(h2 * w3_ref[...], axis=-1) + b3_ref[0]      # [TB] f32
    out_ref[...] = score[None, None, :].astype(out_ref.dtype)   # [1, 1, TB]


def _round_up(n, m):
    return ((n + m - 1) // m) * m


def _physical_vmem_bytes():
    try:
        return int(pltpu.get_tpu_info().vmem_capacity_bytes)
    except Exception:
        return 64 << 20   # conservative fallback (v7x per-core VMEM)


def _choose_tile_b(batch, d, itemsize, target_tile_bytes=4 << 20):
    """Batch tile: ~4 MiB of x per grid step, multiple of 16, >= 2 grid steps."""
    b16 = _round_up(batch, 16)
    t = max(16, (target_tile_bytes // max(d * itemsize, 1)) // 16 * 16)
    if b16 >= 32:
        # Guarantee >= 2 grid steps so v7x's two TensorCores both get tiles.
        t = min(t, max(16, (b16 // 2) // 16 * 16))
    return max(16, min(t, b16))


def ratenet_forward(x, params, *, tile_b=None):
    """Fused RateNet forward. Returns (score, None) like the PyTorch module."""
    w1, t1, w2, t2, w3, b3 = params
    B, D = x.shape
    D1 = w1.shape[1]
    D2 = w2.shape[1]
    itemsize = jnp.dtype(x.dtype).itemsize

    if tile_b is None:
        tile_b = _choose_tile_b(B, D, itemsize)
    else:
        tile_b = max(16, min(_round_up(tile_b, 16), _round_up(B, 16)))
    b_pad = _round_up(B, tile_b)
    num_tiles = b_pad // tile_b

    xp = x if b_pad == B else jnp.pad(x, ((0, b_pad - B), (0, 0)))

    flops = 2 * b_pad * (D * D1 + D1 * D2 + D2)
    bytes_accessed = (b_pad * D * itemsize            # x read directly as f32
                      + (D * D1 + D1 * D2) * 2        # bf16 weights
                      + (D1 + D2 + D2 + 1) * 4        # shifts + scorer row + bias
                      + b_pad * 4)                    # scores out

    physical_vmem = _physical_vmem_bytes()

    def run(single_buffer_weights):
        w_copies = 1 if single_buffer_weights else 2
        vmem_needed = (
            2 * tile_b * D * itemsize                        # x tiles (double buf)
            + 2 * tile_b * 4                                 # out tiles (double buf)
            + w_copies * ((D * D1 + D1 * D2) * 2 + (D1 + 2 * D2) * 4)  # weights
            + tile_b * (D + D1 + D2) * 4                     # intermediates headroom
        )
        vmem_limit = int(min(max(2 * vmem_needed, 8 << 20),
                             int(0.8 * physical_vmem)))

        if single_buffer_weights:
            def const2d(shape):
                return pl.BlockSpec(shape, lambda i: (0, 0),
                                    pipeline_mode=pl.Buffered(1))
        else:
            def const2d(shape):
                return pl.BlockSpec(shape, lambda i: (0, 0))

        return pl.pallas_call(
            _ratenet_kernel,
            out_shape=jax.ShapeDtypeStruct((num_tiles, 1, tile_b), jnp.float32),
            grid=(num_tiles,),
            in_specs=[
                pl.BlockSpec((tile_b, D), lambda i: (i, 0)),          # x tile
                const2d(w1.shape), const2d(t1.shape),                 # fc1 (resident)
                const2d(w2.shape), const2d(t2.shape),                 # fc2 (resident)
                const2d(w3.shape),                                    # scorer row
                pl.BlockSpec(memory_space=pltpu.MemorySpace.SMEM),    # b3 scalar
            ],
            out_specs=pl.BlockSpec((1, 1, tile_b), lambda i: (i, 0, 0)),
            compiler_params=pltpu.CompilerParams(
                dimension_semantics=("parallel",),
                vmem_limit_bytes=vmem_limit,
            ),
            cost_estimate=pl.CostEstimate(
                flops=flops, transcendentals=0, bytes_accessed=bytes_accessed),
        )(xp, w1, t1, w2, t2, w3, b3)

    try:
        out = run(single_buffer_weights=True)
    except Exception:
        # Fallback if this runtime rejects pipeline_mode=pl.Buffered(1).
        out = run(single_buffer_weights=False)

    score = out.reshape(b_pad, 1)[:B]
    return score, None


def init_ratenet_params(key, emb_dim):
    """Deterministic synthetic parameters matching RateNet.__init__ shapes.

    The Linear bias and the eval-mode BatchNorm affine are folded into a
    per-feature (scale, shift); the scale is further folded into the weight
    columns so the kernel only computes `x @ W + shift`. (Folding + bf16 cast
    loses a little precision vs the fp32 PyTorch path.)
    """
    d1, d2 = emb_dim // 2, emb_dim // 4
    ks = jax.random.split(key, 12)
    eps = 1e-5

    def mk_linear(kw, kb, din, dout):
        bound = 1.0 / jnp.sqrt(jnp.float32(din))
        w = jax.random.uniform(kw, (din, dout), jnp.float32, -bound, bound)
        b = jax.random.uniform(kb, (dout,), jnp.float32, -bound, bound)
        return w, b

    def mk_bn(kg, kbt, km, kv, dout):
        gamma = 1.0 + 0.1 * jax.random.normal(kg, (dout,), jnp.float32)
        beta = 0.1 * jax.random.normal(kbt, (dout,), jnp.float32)
        mean = 0.1 * jax.random.normal(km, (dout,), jnp.float32)
        var = jnp.abs(1.0 + 0.1 * jax.random.normal(kv, (dout,), jnp.float32))
        return gamma, beta, mean, var

    # fc1: fold BN scale into W1 columns, Linear bias + BN shift into t1.
    w1, b1 = mk_linear(ks[0], ks[1], emb_dim, d1)
    g1, be1, m1, v1 = mk_bn(ks[2], ks[3], ks[4], ks[5], d1)
    inv1 = g1 / jnp.sqrt(v1 + eps)
    w1f = (w1 * inv1[None, :]).astype(jnp.bfloat16)
    t1 = ((b1 - m1) * inv1 + be1).reshape(1, d1)

    # fc2
    w2, b2 = mk_linear(ks[6], ks[7], d1, d2)
    g2, be2, m2, v2 = mk_bn(ks[8], ks[9], ks[10], ks[11], d2)
    inv2 = g2 / jnp.sqrt(v2 + eps)
    w2f = (w2 * inv2[None, :]).astype(jnp.bfloat16)
    t2 = ((b2 - m2) * inv2 + be2).reshape(1, d2)

    # get_score: keep as an f32 row for the VPU multiply + lane reduce.
    kw3, kb3 = jax.random.split(jax.random.fold_in(key, 999))
    w3, b3 = mk_linear(kw3, kb3, d2, 1)
    w3 = w3.reshape(1, d2)
    b3 = b3.reshape(1)

    return (w1f, t1, w2f, t2, w3, b3)


def ratenet_ref(x, params):
    """Pure-JAX reference with matching precision (bf16 matmuls, f32 accum)."""
    w1, t1, w2, t2, w3, b3 = params
    z1 = jnp.dot(x.astype(jnp.bfloat16), w1, preferred_element_type=jnp.float32)
    h1 = jnp.maximum(z1 + t1, 0.0)
    z2 = jnp.dot(h1.astype(jnp.bfloat16), w2, preferred_element_type=jnp.float32)
    h2 = jnp.maximum(z2 + t2, 0.0)
    return jnp.sum(h2 * w3, axis=-1, keepdims=True) + b3


if __name__ == "__main__":
    key = jax.random.PRNGKey(0)
    batch, emb_dim = 20, 32          # exercises batch padding (20 -> 32, 2 tiles)
    kx, kp = jax.random.split(key)

    x = jax.random.normal(kx, (batch, emb_dim), jnp.float32)
    params = init_ratenet_params(kp, emb_dim)

    score, none_out = ratenet_forward(x, params)   # auto tile_b -> 16, 2 tiles
    score = jax.block_until_ready(score)
    assert none_out is None
    assert score.shape == (batch, 1)

    ref = ratenet_ref(x, params)
    assert jnp.allclose(score, ref, atol=1e-2, rtol=1e-2), "mismatch vs reference"

    print("KERNEL_OK")
</pallas_src>

<mosaic_0001>
module attributes {stable_mosaic.version = 11 : i64} {
  func.func @_ratenet_kernel(%arg0: i32, %arg1: memref<16x32xf32, #tpu.memory_space<vmem>>, %arg2: memref<32x16xbf16, #tpu.memory_space<vmem>>, %arg3: memref<1x16xf32, #tpu.memory_space<vmem>>, %arg4: memref<16x8xbf16, #tpu.memory_space<vmem>>, %arg5: memref<1x8xf32, #tpu.memory_space<vmem>>, %arg6: memref<1x8xf32, #tpu.memory_space<vmem>>, %arg7: memref<1xf32, #tpu.memory_space<smem>>, %arg8: memref<1x1x16xf32, #tpu.memory_space<vmem>>) attributes {dimension_semantics = [#tpu.dimension_semantics<parallel>], iteration_bounds = array<i64: 2>, scalar_prefetch = 0 : i64, scratch_operands = 0 : i64, tpu.core_type = #tpu.core_type<tc>, window_params = [{transform_indices = @transform_0, window_bounds = array<i64: 16, 32>}, {pipeline_mode = #tpu.pipeline_mode<synchronous>, transform_indices = @transform_1, window_bounds = array<i64: 32, 16>}, {pipeline_mode = #tpu.pipeline_mode<synchronous>, transform_indices = @transform_2, window_bounds = array<i64: 1, 16>}, {pipeline_mode = #tpu.pipeline_mode<synchronous>, transform_indices = @transform_3, window_bounds = array<i64: 16, 8>}, {pipeline_mode = #tpu.pipeline_mode<synchronous>, transform_indices = @transform_4, window_bounds = array<i64: 1, 8>}, {pipeline_mode = #tpu.pipeline_mode<synchronous>, transform_indices = @transform_5, window_bounds = array<i64: 1, 8>}, {transform_indices = @transform_6, window_bounds = array<i64: 1>}, {transform_indices = @transform_7, window_bounds = array<i64: 1, 1, 16>}]} {
    %c0 = arith.constant 0 : index
    %c0_0 = arith.constant 0 : index
    %0 = vector.load %arg1[%c0, %c0_0] : memref<16x32xf32, #tpu.memory_space<vmem>>, vector<16x32xf32>
    %1 = arith.truncf %0 : vector<16x32xf32> to vector<16x32xbf16>
    %c0_1 = arith.constant 0 : index
    %c0_2 = arith.constant 0 : index
    %2 = vector.load %arg2[%c0_1, %c0_2] : memref<32x16xbf16, #tpu.memory_space<vmem>>, vector<32x16xbf16>
    %cst = arith.constant dense<0.000000e+00> : vector<16x16xf32>
    %3 = tpu.matmul %1, %2, %cst {dimension_numbers = #tpu.dot_dimension_numbers<[1], [0], [0], [1], [0, 0, 1, 1], [], []>} : vector<16x32xbf16>, vector<32x16xbf16>, vector<16x16xf32> -> vector<16x16xf32>
    %c0_3 = arith.constant 0 : index
    %c0_4 = arith.constant 0 : index
    %4 = vector.load %arg3[%c0_3, %c0_4] : memref<1x16xf32, #tpu.memory_space<vmem>>, vector<1x16xf32>
    %5 = vector.broadcast %4 : vector<1x16xf32> to vector<16x16xf32>
    %6 = arith.addf %3, %5 : vector<16x16xf32>
    %cst_5 = arith.constant 0.000000e+00 : f32
    %7 = vector.broadcast %cst_5 : f32 to vector<16x16xf32>
    %8 = arith.maximumf %6, %7 : vector<16x16xf32>
    %9 = arith.truncf %8 : vector<16x16xf32> to vector<16x16xbf16>
    %c0_6 = arith.constant 0 : index
    %c0_7 = arith.constant 0 : index
    %10 = vector.load %arg4[%c0_6, %c0_7] : memref<16x8xbf16, #tpu.memory_space<vmem>>, vector<16x8xbf16>
    %cst_8 = arith.constant dense<0.000000e+00> : vector<16x8xf32>
    %11 = tpu.matmul %9, %10, %cst_8 {dimension_numbers = #tpu.dot_dimension_numbers<[1], [0], [0], [1], [0, 0, 1, 1], [], []>} : vector<16x16xbf16>, vector<16x8xbf16>, vector<16x8xf32> -> vector<16x8xf32>
    %c0_9 = arith.constant 0 : index
    %c0_10 = arith.constant 0 : index
    %12 = vector.load %arg5[%c0_9, %c0_10] : memref<1x8xf32, #tpu.memory_space<vmem>>, vector<1x8xf32>
    %13 = vector.broadcast %12 : vector<1x8xf32> to vector<16x8xf32>
    %14 = arith.addf %11, %13 : vector<16x8xf32>
    %cst_11 = arith.constant 0.000000e+00 : f32
    %15 = vector.broadcast %cst_11 : f32 to vector<16x8xf32>
    %16 = arith.maximumf %14, %15 : vector<16x8xf32>
    %c0_12 = arith.constant 0 : index
    %c0_13 = arith.constant 0 : index
    %17 = vector.load %arg6[%c0_12, %c0_13] : memref<1x8xf32, #tpu.memory_space<vmem>>, vector<1x8xf32>
    %18 = vector.broadcast %17 : vector<1x8xf32> to vector<16x8xf32>
    %19 = arith.mulf %16, %18 : vector<16x8xf32>
    %cst_14 = arith.constant dense<0.000000e+00> : vector<16xf32>
    %20 = vector.multi_reduction <add>, %19, %cst_14 [1] : vector<16x8xf32> to vector<16xf32>
    %c0_15 = arith.constant 0 : index
    %21 = memref.load %arg7[%c0_15] : memref<1xf32, #tpu.memory_space<smem>>
    %22 = vector.broadcast %21 : f32 to vector<16xf32>
    %23 = arith.addf %20, %22 : vector<16xf32>
    %24 = vector.shape_cast %23 : vector<16xf32> to vector<1x1x16xf32>
    %c0_16 = arith.constant 0 : index
    %c0_17 = arith.constant 0 : index
    %c0_18 = arith.constant 0 : index
    %25 = vector.load %arg8[%c0_16, %c0_17, %c0_18] : memref<1x1x16xf32, #tpu.memory_space<vmem>>, vector<1x1x16xf32>
    tpu.vector_store %arg8[%c0_16, %c0_17, %c0_18], %24 {strides = array<i32>} : memref<1x1x16xf32, #tpu.memory_space<vmem>>, vector<1x1x16xf32>,
    return
  }
  func.func @transform_0(%arg0: i32) -> (i32, i32) {
    %c0_i32 = arith.constant 0 : i32
    %c0_i32_0 = arith.constant 0 : i32
    return %arg0, %c0_i32 : i32, i32
  }
  func.func @transform_1(%arg0: i32) -> (i32, i32) {
    %c0_i32 = arith.constant 0 : i32
    %c0_i32_0 = arith.constant 0 : i32
    %c0_i32_1 = arith.constant 0 : i32
    return %c0_i32, %c0_i32_0 : i32, i32
  }
  func.func @transform_2(%arg0: i32) -> (i32, i32) {
    %c0_i32 = arith.constant 0 : i32
    %c0_i32_0 = arith.constant 0 : i32
    %c0_i32_1 = arith.constant 0 : i32
    return %c0_i32, %c0_i32_0 : i32, i32
  }
  func.func @transform_3(%arg0: i32) -> (i32, i32) {
    %c0_i32 = arith.constant 0 : i32
    %c0_i32_0 = arith.constant 0 : i32
    %c0_i32_1 = arith.constant 0 : i32
    return %c0_i32, %c0_i32_0 : i32, i32
  }
  func.func @transform_4(%arg0: i32) -> (i32, i32) {
    %c0_i32 = arith.constant 0 : i32
    %c0_i32_0 = arith.constant 0 : i32
    %c0_i32_1 = arith.constant 0 : i32
    return %c0_i32, %c0_i32_0 : i32, i32
  }
  func.func @transform_5(%arg0: i32) -> (i32, i32) {
    %c0_i32 = arith.constant 0 : i32
    %c0_i32_0 = arith.constant 0 : i32
    %c0_i32_1 = arith.constant 0 : i32
    return %c0_i32, %c0_i32_0 : i32, i32
  }
  func.func @transform_6(%arg0: i32) -> i32 {
    %c0_i32 = arith.constant 0 : i32
    %c0_i32_0 = arith.constant 0 : i32
    return %c0_i32 : i32
  }
  func.func @transform_7(%arg0: i32) -> (i32, i32, i32) {
    %c0_i32 = arith.constant 0 : i32
    %c0_i32_0 = arith.constant 0 : i32
    %c0_i32_1 = arith.constant 0 : i32
    return %arg0, %c0_i32, %c0_i32_0 : i32, i32, i32
  }
}

module attributes {stable_mosaic.version = 11 : i64} {
  func.func @_ratenet_kernel(%arg0: i32, %arg1: memref<16x32xf32, #tpu.memory_space<vmem>>, %arg2: memref<32x16xbf16, #tpu.memory_space<vmem>>, %arg3: memref<1x16xf32, #tpu.memory_space<vmem>>, %arg4: memref<16x8xbf16, #tpu.memory_space<vmem>>, %arg5: memref<1x8xf32, #tpu.memory_space<vmem>>, %arg6: memref<1x8xf32, #tpu.memory_space<vmem>>, %arg7: memref<1xf32, #tpu.memory_space<smem>>, %arg8: memref<1x1x16xf32, #tpu.memory_space<vmem>>) attributes {dimension_semantics = [#tpu.dimension_semantics<parallel>], iteration_bounds = array<i64: 2>, scalar_prefetch = 0 : i64, scratch_operands = 0 : i64, tpu.core_type = #tpu.core_type<tc>, window_params = [{transform_indices = @transform_0, window_bounds = array<i64: 16, 32>}, {pipeline_mode = #tpu.pipeline_mode<synchronous>, transform_indices = @transform_1, window_bounds = array<i64: 32, 16>}, {pipeline_mode = #tpu.pipeline_mode<synchronous>, transform_indices = @transform_2, window_bounds = array<i64: 1, 16>}, {pipeline_mode = #tpu.pipeline_mode<synchronous>, transform_indices = @transform_3, window_bounds = array<i64: 16, 8>}, {pipeline_mode = #tpu.pipeline_mode<synchronous>, transform_indices = @transform_4, window_bounds = array<i64: 1, 8>}, {pipeline_mode = #tpu.pipeline_mode<synchronous>, transform_indices = @transform_5, window_bounds = array<i64: 1, 8>}, {transform_indices = @transform_6, window_bounds = array<i64: 1>}, {transform_indices = @transform_7, window_bounds = array<i64: 1, 1, 16>}]} {
    %c0 = arith.constant 0 : index
    %c0_0 = arith.constant 0 : index
    %0 = vector.load %arg1[%c0, %c0_0] : memref<16x32xf32, #tpu.memory_space<vmem>>, vector<16x32xf32>
    %1 = arith.truncf %0 : vector<16x32xf32> to vector<16x32xbf16>
    %c0_1 = arith.constant 0 : index
    %c0_2 = arith.constant 0 : index
    %2 = vector.load %arg2[%c0_1, %c0_2] : memref<32x16xbf16, #tpu.memory_space<vmem>>, vector<32x16xbf16>
    %cst = arith.constant dense<0.000000e+00> : vector<16x16xf32>
    %3 = tpu.matmul %1, %2, %cst {dimension_numbers = #tpu.dot_dimension_numbers<[1], [0], [0], [1], [0, 0, 1, 1], [], []>} : vector<16x32xbf16>, vector<32x16xbf16>, vector<16x16xf32> -> vector<16x16xf32>
    %c0_3 = arith.constant 0 : index
    %c0_4 = arith.constant 0 : index
    %4 = vector.load %arg3[%c0_3, %c0_4] : memref<1x16xf32, #tpu.memory_space<vmem>>, vector<1x16xf32>
    %5 = vector.broadcast %4 : vector<1x16xf32> to vector<16x16xf32>
    %6 = arith.addf %3, %5 : vector<16x16xf32>
    %cst_5 = arith.constant 0.000000e+00 : f32
    %7 = vector.broadcast %cst_5 : f32 to vector<16x16xf32>
    %8 = arith.maximumf %6, %7 : vector<16x16xf32>
    %9 = arith.truncf %8 : vector<16x16xf32> to vector<16x16xbf16>
    %c0_6 = arith.constant 0 : index
    %c0_7 = arith.constant 0 : index
    %10 = vector.load %arg4[%c0_6, %c0_7] : memref<16x8xbf16, #tpu.memory_space<vmem>>, vector<16x8xbf16>
    %cst_8 = arith.constant dense<0.000000e+00> : vector<16x8xf32>
    %11 = tpu.matmul %9, %10, %cst_8 {dimension_numbers = #tpu.dot_dimension_numbers<[1], [0], [0], [1], [0, 0, 1, 1], [], []>} : vector<16x16xbf16>, vector<16x8xbf16>, vector<16x8xf32> -> vector<16x8xf32>
    %c0_9 = arith.constant 0 : index
    %c0_10 = arith.constant 0 : index
    %12 = vector.load %arg5[%c0_9, %c0_10] : memref<1x8xf32, #tpu.memory_space<vmem>>, vector<1x8xf32>
    %13 = vector.broadcast %12 : vector<1x8xf32> to vector<16x8xf32>
    %14 = arith.addf %11, %13 : vector<16x8xf32>
    %cst_11 = arith.constant 0.000000e+00 : f32
    %15 = vector.broadcast %cst_11 : f32 to vector<16x8xf32>
    %16 = arith.maximumf %14, %15 : vector<16x8xf32>
    %c0_12 = arith.constant 0 : index
    %c0_13 = arith.constant 0 : index
    %17 = vector.load %arg6[%c0_12, %c0_13] : memref<1x8xf32, #tpu.memory_space<vmem>>, vector<1x8xf32>
    %18 = vector.broadcast %17 : vector<1x8xf32> to vector<16x8xf32>
    %19 = arith.mulf %16, %18 : vector<16x8xf32>
    %cst_14 = arith.constant dense<0.000000e+00> : vector<16xf32>
    %20 = vector.multi_reduction <add>, %19, %cst_14 [1] : vector<16x8xf32> to vector<16xf32>
    %c0_15 = arith.constant 0 : index
    %21 = memref.load %arg7[%c0_15] : memref<1xf32, #tpu.memory_space<smem>>
    %22 = vector.broadcast %21 : f32 to vector<16xf32>
    %23 = arith.addf %20, %22 : vector<16xf32>
    %24 = vector.shape_cast %23 : vector<16xf32> to vector<1x1x16xf32>
    %c0_16 = arith.constant 0 : index
    %c0_17 = arith.constant 0 : index
    %c0_18 = arith.constant 0 : index
    %25 = vector.load %arg8[%c0_16, %c0_17, %c0_18] : memref<1x1x16xf32, #tpu.memory_space<vmem>>, vector<1x1x16xf32>
    tpu.vector_store %arg8[%c0_16, %c0_17, %c0_18], %24 {strides = array<i32>} : memref<1x1x16xf32, #tpu.memory_space<vmem>>, vector<1x1x16xf32>,
    return
  }
  func.func @transform_0(%arg0: i32) -> (i32, i32) {
    %c0_i32 = arith.constant 0 : i32
    %c0_i32_0 = arith.constant 0 : i32
    return %arg0, %c0_i32 : i32, i32
  }
  func.func @transform_1(%arg0: i32) -> (i32, i32) {
    %c0_i32 = arith.constant 0 : i32
    %c0_i32_0 = arith.constant 0 : i32
    %c0_i32_1 = arith.constant 0 : i32
    return %c0_i32, %c0_i32_0 : i32, i32
  }
  func.func @transform_2(%arg0: i32) -> (i32, i32) {
    %c0_i32 = arith.constant 0 : i32
    %c0_i32_0 = arith.constant 0 : i32
    %c0_i32_1 = arith.constant 0 : i32
    return %c0_i32, %c0_i32_0 : i32, i32
  }
  func.func @transform_3(%arg0: i32) -> (i32, i32) {
    %c0_i32 = arith.constant 0 : i32
    %c0_i32_0 = arith.constant 0 : i32
    %c0_i32_1 = arith.constant 0 : i32
    return %c0_i32, %c0_i32_0 : i32, i32
  }
  func.func @transform_4(%arg0: i32) -> (i32, i32) {
    %c0_i32 = arith.constant 0 : i32
    %c0_i32_0 = arith.constant 0 : i32
    %c0_i32_1 = arith.constant 0 : i32
    return %c0_i32, %c0_i32_0 : i32, i32
  }
  func.func @transform_5(%arg0: i32) -> (i32, i32) {
    %c0_i32 = arith.constant 0 : i32
    %c0_i32_0 = arith.constant 0 : i32
    %c0_i32_1 = arith.constant 0 : i32
    return %c0_i32, %c0_i32_0 : i32, i32
  }
  func.func @transform_6(%arg0: i32) -> i32 {
    %c0_i32 = arith.constant 0 : i32
    %c0_i32_0 = arith.constant 0 : i32
    return %c0_i32 : i32
  }
  func.func @transform_7(%arg0: i32) -> (i32, i32, i32) {
    %c0_i32 = arith.constant 0 : i32
    %c0_i32_0 = arith.constant 0 : i32
    %c0_i32_1 = arith.constant 0 : i32
    return %arg0, %c0_i32, %c0_i32_0 : i32, i32, i32
  }
}

</mosaic_0001>

<bundles_post_ra>
// kernel: tpu_custom_call.1
= control target key start
LH: loop header
LB: loop body
LE: loop exit
PB: predicated region body
PF: predicated region fallthrough
CT: control target
= control target key end

     0   :  { %s829_s0 = inlined_call_operand.vmem [shape: f32[32,32], index: 0, kind: input, shape index: {}]   ;;  %s830_s1 = inlined_call_operand.vmem [shape: bf16[32,16], index: 1, kind: input, shape index: {}]   ;;  %s831_s2 = inlined_call_operand.vmem [shape: f32[1,16], index: 2, kind: input, shape index: {}]   ;;  %s832_s3 = inlined_call_operand.vmem [shape: bf16[16,8], index: 3, kind: input, shape index: {}]   ;;  %s833_s4 = inlined_call_operand.vmem [shape: f32[1,8], index: 4, kind: input, shape index: {}]   ;;  %s834_s5 = inlined_call_operand.vmem [shape: f32[1,8], index: 5, kind: input, shape index: {}]   ;;  %s835_s6 = inlined_call_operand.<no memory space> [shape: f32[1], index: 6, kind: input, shape index: {}]   ;;  %s836_s7 = inlined_call_operand.hbm [shape: f32[2,1,16], index: 7, kind: output, shape index: {}]  }
   0x1   :  { %12 = sst [smem:[#allocation2]] %s835_s6 }
   0x2   :  { %13 = vsyncpa [#allocation4], 0 }
   0x3   :  { %15 = vsyncpa [#allocation4 + $0x1], 0  ;;  %s712_s26 = smov 0   ;;  %s714_s27 = smov 0  }
   0x4   :  { %s716_s28 = smov 0   ;;  %s718_s29 = smov 0  }
   0x5 LB: > { %s733_s6 = sadd.s32 4294967295, %s664_s29   ;;  %s522_s30 = sadd.s32 4294967294, %s664_s29   ;;  %s664_s29 = sphi %s718_s29, %s842_s29   ;;  %s660_s28 = sphi %s716_s28, %s841_s28   ;;  %s656_s27 = sphi %s714_s27, %s840_s27   ;;  %s652_s26 = sphi %s712_s26, %s839_s26  }
   0x6   : > { %s737_s8 = sadd.s32 1, %s664_s29   ;;  %s180_s9 = sadd.s32 1, %s660_s28 }
   0x7   : > { %s177_s10 = ssub.s32 %s664_s29, %s737_s8  ;;  %p190_p0 = scmp.ne.s32.totalorder %s660_s28, %s656_s27 }
   0x8   : > { %p178_p1 = scmp.eq.s32.totalorder %s177_s10, 0  ;;  %p191_p2 = scmp.eq.s32.totalorder %s733_s6, 1 }
   0x9   : > { %p196_p3 = scmp.ne.s32.totalorder %s656_s27, %s652_s26  ;;  %p197_p4 = scmp.eq.s32.totalorder %s522_s30, 1 }
   0xa   : > { %s748_s11 = scalar_select %p178_p1, %s660_s28, %s180_s9  }
   0xb   : > { %p750_p5 = por %p191_p2, %p190_p0  ;;  %p754_p6 = por %p197_p4, %p196_p3 }
   0xc   : > { %p525_p7 = scmp.ge.s32.totalorder %s664_s29, 1  ;;  %p242_p8 = scmp.lt.s32.totalorder %s664_s29, 3 }
   0xe   : > { %p243_p9 = pnand %p525_p7, %p242_p8 }
   0xf   : > { %v599_v0 = vld [vmem:[%s830_s1] sm:$0xff] (!%p243_p9)   ;;  %v666_v1 = vmov (!%p243_p9), 0.0   ;;  %v600_v2 = vld [vmem:[%s830_s1 + $0x8] sm:$0xff] (!%p243_p9)   ;;  %vm667_vm0 = vmmov (!%p243_p9), 0   ;;  %s526_s18 = sshll.u32 (!%p243_p9), %s733_s6, 1  ;;  %vm306_vm1 = vcmask (!%p243_p9), 261120   ;;  %v438_v31 = vlaneseq (!%p243_p9) }
  0x10   : > { %246 = sbr.rel (%p243_p9) target bundleno = 633 (0x279), region = 48  ;;  %544 = vmatprep.subr.bf16.mxu0 (!%p243_p9), %v666_v1  ;;  %552 = vmatprep.subr.bf16.mxu1 (!%p243_p9), %v666_v1  ;;  %p274_p10 = scmp.lt.s32.totalorder (!%p243_p9), %s526_s18, 3  ;;  %v601_v6 = vld [vmem:[%s832_s3] sm:$0xff] (!%p243_p9)   ;;  %vm369_vm2 = vcmask (!%p243_p9), 130048   ;;  %vm425_vm3 = vcmask (!%p243_p9), 64512   ;;  %vm449_vm4 = vcmask (!%p243_p9), 130112  }
  0x11   : > { %545 = vmatpush3.bf16.msra.mxu0 (!%p243_p9), %v599_v0  ;;  %548 = vmatprep.mubr.msk.bf16.mxu0 (!%p243_p9), %vm667_vm0, %v666_v1  ;;  %v528_v7 = vld [vmem:[%s831_s2] ss:$0 sm:$0xff] (!%p243_p9)  ;;  %s432_s16 = sld [smem:[#allocation2]] (!%p243_p9)  ;;  %v439_v32 = vand.u32 (!%p243_p9), 127, %v438_v31  ;;  %v441_v33 = vshrl.u32 (!%p243_p9), %v438_v31, 7  ;;  %s271_s17 = sand.u32 (!%p243_p9), 1, %s656_s27  }
  0x12   : > { %546 = vmatprep.subr.bf16.mxu0 (!%p243_p9), %v666_v1  ;;  %554 = vmatprep.mubr.msk.bf16.mxu1 (!%p243_p9), %vm667_vm0, %v666_v1  ;;  %v532_v17 = vld [vmem:[%s833_s4] ss:$0 sm:$0xff] (!%p243_p9)  ;;  %vm452_vm5 = vcmask (!%p243_p9), 122880   ;;  %s455_s24 = scalar_lea.sflag (!%p243_p9), [#allocation4], %s271_s17  ;;  %s668_s25 = smov (!%p243_p9), [#allocation3]  }
  0x13   : > { %553 = vmatpush3.bf16.msra.mxu1 (!%p243_p9), %v601_v6  ;;  %v535_v22 = vld [vmem:[%s834_s5] ss:$0 sm:$0xff] (!%p243_p9)  ;;  %v444_v34 = vadd.s32 (!%p243_p9), 4294967288, %v439_v32  ;;  %v442_v37 = vsub.s32 (!%p243_p9), %v439_v32, %v441_v33  ;;  %s606_s30 = sshll.u32 (!%p243_p9), %s668_s25, 4  ;;  %s607_s30 = int_to_ptr.vmem [resolvable:$false] %s606_s30 }
  0x14   : > { %s608_s9 = scalar_lea.vmem (!%p243_p9), %s607_s30, 32 }
  0x15   : > { %547 = vmatpush3.bf16.msra.mxu0 (!%p243_p9), %v600_v2  ;;  %v447_v39 = vsub.s32 (!%p243_p9), %v444_v34, %v441_v33 }
  0x17   : > { %s844_s18 = smov (!%p274_p10, %s526_s18), 3  ;;  %v433_v35 = vstv %s432_s16 }
  0x18   : > { %s527_s19 = sshll.u32 %s844_s18, 3  ;;  %s536_s18 = sshll.u32 %s733_s6, 4 }
  0x19   : > { %s277_s22 = scalar_lea.vmem %s829_s0, %s527_s19  ;;  %s272_s19 = scalar_lea.vmem [#allocation3], %s271_s17 }
  0x1a   : > { %v280_v3 = vld [vmem:[%s277_s22] sm:$0xff]  ;;  %v281_v4 = vld [vmem:[%s277_s22 + $0x8] sm:$0xff]  ;;  %s467_s20 = sshll.u32 %s272_s19, 4  ;;  %s787_s23 = scalar_lea.hbm %s836_s7, %s536_s18  ;;  %s789_s20 = int_to_ptr.vmem [resolvable:$true] %s467_s20 }
  0x1b   : > { %v282_v5 = vpack.c.bf16 %v281_v4, %v280_v3  ;;  %s602_s6 = scalar_lea.vmem %s789_s20, 16  ;;  %p609_p0 = scmp.lt.s32.totalorder %s789_s20, %s607_s30 }
  0x1c   : > { %p603_p11 = scmp.ne.s32.totalorder %s789_s20, %s602_s6  ;;  %p610_p1 = scmp.lt.s32.totalorder %s608_s9, %s602_s6 }
  0x1d   : > { %549 = vmatmul.mubr.msk.bf16.vlgmr.msra.gmra.mrb[0].mxu0 %vm306_vm1, %v282_v5 }
  0x1e   : > { %p604_p12 = pnand %p603_p11, %p750_p5  ;;  %p611_p2 = por %p610_p1, %p609_p0 }
  0x20   : > { %p605_p13 = pneg %p604_p12 }
  0x22   : > { %p612_p3 = pnand %p611_p2, %p605_p13 }
  0xf0   : > { %v344_v8 = vpop.f32.mrb[0].mxu0 }
  0xf1   : > { %v345_v9 = vadd.f32 %v528_v7, %v344_v8  ;;  %v550_v10 = vpop.f32.mrb[1].mxu0 }
  0xf2   : > { %v347_v11 = vpop.f32.mrb[2].mxu0 }
  0xf3   : > { %v348_v12 = vadd.f32 %v528_v7, %v347_v11  ;;  %v551_v13 = vpop.f32.mrb[3].mxu0  ;;  %v351_v14 = vmax.f32 %v345_v9, 0.0 }
  0xf5   : > { %v352_v15 = vmax.f32 %v348_v12, 0.0 }
  0xf7   : > { %v353_v16 = vpack.c.bf16 %v352_v15, %v351_v14 }
  0xf9   : > { %555 = vmatmul.mubr.msk.bf16.vlgmr.msra.gmra.mrb[0].mxu1 %vm369_vm2, %v353_v16 }
 0x1cc   : > { %v407_v18 = vpop.f32.mrb[0].mxu1 }
 0x1cd   : > { %v408_v19 = vadd.f32 %v532_v17, %v407_v18  ;;  %v556_v20 = vpop.f32.mrb[1].mxu1 }
 0x1ce   : > { %v410_v21 = vpop.f32.mrb[2].mxu1 }
 0x1cf   : > { %v414_v23 = vmax.f32 %v408_v19, 0.0  ;;  %v411_v24 = vadd.f32 %v532_v17, %v410_v21  ;;  %v557_v25 = vpop.f32.mrb[3].mxu1 }
 0x1d1   : > { %v415_v26 = vmax.f32 %v411_v24, 0.0  ;;  %v423_v27 = vmul.f32 %v535_v22, %v414_v23 }
 0x1d3   : > { %v426_v28 = vsel %vm425_vm3, %v423_v27, 0.0  ;;  %v424_v29 = vmul.f32 %v535_v22, %v415_v26 }
 0x1d4   : > { %427 = vadd.xlane.f32.xlu0 %v426_v28 }
 0x1d5   : > { %v429_v30 = vsel %vm425_vm3, %v424_v29, 0.0 }
 0x1d8   : > { %430 = vadd.xlane.f32.xlu0 %v429_v30 }
 0x261   : > { %v428_v36 = vpop.xlane.xlu0 %427 }
 0x262   : > { %v434_v38 = vadd.f32 %v433_v35, %v428_v36 }
 0x264   : > { %v443_v42 = vrot.slane %v434_v38, %v442_v37 }
 0x265   : > { %v431_v40 = vpop.xlane.xlu0 %430 }
 0x266   : > { %v435_v41 = vadd.f32 %v433_v35, %v431_v40 }
 0x268   : > { %v448_v43 = vrot.slane %v435_v41, %v447_v39 }
 0x26a   : > { %v450_v44 = vsel %vm449_vm4, %v448_v43, %v443_v42 }
 0x26b   : > { %453 = vst.msk [vmem:[%s272_s19] sm:$0x1] %vm452_vm5, %v450_v44 }
 0x26c   : > { %615 = shalt.err (!%p612_p3)
}
 0x26d   : > { %s616_s10 = scalar_lea.hbm %s787_s23, 16  ;;  %s620_s16 = scalar_lea.hbm %s836_s7, 32 }
 0x26e   : > { %p617_p4 = scmp.ne.s32.totalorder %s787_s23, %s616_s10  ;;  %p621_p9 = scmp.lt.u32.totalorder %s787_s23, %s836_s7 }
 0x26f   : > { %p622_p10 = scmp.lt.u32.totalorder %s620_s16, %s616_s10  ;;  %p624_p12 = scmp.lt.u32.totalorder %s616_s10, %s787_s23 }
 0x270   : > { %p618_p7 = pnand %p617_p4, %p750_p5 }
 0x271   : > { %p623_p11 = por %p622_p10, %p621_p9 }
 0x272   : > { %p619_p8 = pneg %p618_p7 }
 0x273   : > { %p625_p13 = por %p624_p12, %p623_p11 }
 0x275   : > { %p626_p0 = pnand %p625_p13, %p619_p8 }
 0x277   : > { %629 = shalt.err (!%p626_p0)
}
 0x278   : > { %558 = dma.vmem_to_hbm [thread:$0]  (%p750_p5), %s789_s20, 16, %s787_s23, %s455_s24  }
 0x279 PF: > { %p564_p1 = scmp.ge.s32.totalorder %s664_s29, 2  ;;  %s479_s19 = sand.u32 1, %s652_s26  }
 0x27a   : > { %s480_s21 = scalar_lea.sflag [#allocation4], %s479_s19 }
 0x27b   : > { %p561_p2 = pnand %p564_p1, %p754_p6 }
 0x27d   : > { %647 = dma.done.wait (!%p561_p2), %s480_s21, 16  }
 0x27e   : > { %649 = vsyncadd (!%p561_p2), %s480_s21, 4294967280  ;;  %p18_p3 = scmp.ge.s32.totalorder %s737_s8, 4   ;;  %s839_s26 = smov %s656_s27 }
 0x27f   : > { %s840_s27 = smov %s660_s28  ;;  %s841_s28 = smov %s748_s11 }
 0x280   : > { %s842_s29 = smov %s737_s8  ;;  %20 = sbr.rel (!%p18_p3) target bundleno = 5 (0x5), region = 83 }
 0x287   :  { %484 = vsyncpa [#allocation4], 1 }
 0x288   :  { %486 = vsyncpa [#allocation4 + $0x1], 1 }

// kernel: tpu_custom_call.1
= control target key start
LH: loop header
LB: loop body
LE: loop exit
PB: predicated region body
PF: predicated region fallthrough
CT: control target
= control target key end

     0   :  { %s829_s0 = inlined_call_operand.vmem [shape: f32[32,32], index: 0, kind: input, shape index: {}]   ;;  %s830_s1 = inlined_call_operand.vmem [shape: bf16[32,16], index: 1, kind: input, shape index: {}]   ;;  %s831_s2 = inlined_call_operand.vmem [shape: f32[1,16], index: 2, kind: input, shape index: {}]   ;;  %s832_s3 = inlined_call_operand.vmem [shape: bf16[16,8], index: 3, kind: input, shape index: {}]   ;;  %s833_s4 = inlined_call_operand.vmem [shape: f32[1,8], index: 4, kind: input, shape index: {}]   ;;  %s834_s5 = inlined_call_operand.vmem [shape: f32[1,8], index: 5, kind: input, shape index: {}]   ;;  %s835_s6 = inlined_call_operand.<no memory space> [shape: f32[1], index: 6, kind: input, shape index: {}]   ;;  %s836_s7 = inlined_call_operand.hbm [shape: f32[2,1,16], index: 7, kind: output, shape index: {}]  }
   0x1   :  { %12 = sst [smem:[#allocation2]] %s835_s6 }
   0x2   :  { %13 = vsyncpa [#allocation4], 0 }
   0x3   :  { %15 = vsyncpa [#allocation4 + $0x1], 0  ;;  %s712_s26 = smov 0   ;;  %s714_s27 = smov 0  }
   0x4   :  { %s716_s28 = smov 0   ;;  %s718_s29 = smov 0  }
   0x5 LB: > { %s733_s6 = sadd.s32 4294967295, %s664_s29   ;;  %s522_s30 = sadd.s32 4294967294, %s664_s29   ;;  %s664_s29 = sphi %s718_s29, %s842_s29   ;;  %s660_s28 = sphi %s716_s28, %s841_s28   ;;  %s656_s27 = sphi %s714_s27, %s840_s27   ;;  %s652_s26 = sphi %s712_s26, %s839_s26  }
   0x6   : > { %s737_s8 = sadd.s32 1, %s664_s29   ;;  %s180_s9 = sadd.s32 1, %s660_s28 }
   0x7   : > { %s177_s10 = ssub.s32 %s664_s29, %s737_s8  ;;  %p190_p0 = scmp.ne.s32.totalorder %s660_s28, %s656_s27 }
   0x8   : > { %p178_p1 = scmp.eq.s32.totalorder %s177_s10, 0  ;;  %p191_p2 = scmp.eq.s32.totalorder %s733_s6, 1 }
   0x9   : > { %p196_p3 = scmp.ne.s32.totalorder %s656_s27, %s652_s26  ;;  %p197_p4 = scmp.eq.s32.totalorder %s522_s30, 1 }
   0xa   : > { %s748_s11 = scalar_select %p178_p1, %s660_s28, %s180_s9  }
   0xb   : > { %p750_p5 = por %p191_p2, %p190_p0  ;;  %p754_p6 = por %p197_p4, %p196_p3 }
   0xc   : > { %p525_p7 = scmp.ge.s32.totalorder %s664_s29, 1  ;;  %p242_p8 = scmp.lt.s32.totalorder %s664_s29, 3 }
   0xe   : > { %p243_p9 = pnand %p525_p7, %p242_p8 }
   0xf   : > { %v599_v0 = vld [vmem:[%s830_s1] sm:$0xff] (!%p243_p9)   ;;  %v666_v1 = vmov (!%p243_p9), 0.0   ;;  %v600_v2 = vld [vmem:[%s830_s1 + $0x8] sm:$0xff] (!%p243_p9)   ;;  %vm667_vm0 = vmmov (!%p243_p9), 0   ;;  %s526_s18 = sshll.u32 (!%p243_p9), %s733_s6, 1  ;;  %vm306_vm1 = vcmask (!%p243_p9), 261120   ;;  %v438_v31 = vlaneseq (!%p243_p9) }
  0x10   : > { %246 = sbr.rel (%p243_p9) target bundleno = 633 (0x279), region = 48  ;;  %544 = vmatprep.subr.bf16.mxu0 (!%p243_p9), %v666_v1  ;;  %552 = vmatprep.subr.bf16.mxu1 (!%p243_p9), %v666_v1  ;;  %p274_p10 = scmp.lt.s32.totalorder (!%p243_p9), %s526_s18, 3  ;;  %v601_v6 = vld [vmem:[%s832_s3] sm:$0xff] (!%p243_p9)   ;;  %vm369_vm2 = vcmask (!%p243_p9), 130048   ;;  %vm425_vm3 = vcmask (!%p243_p9), 64512   ;;  %vm449_vm4 = vcmask (!%p243_p9), 130112  }
  0x11   : > { %545 = vmatpush3.bf16.msra.mxu0 (!%p243_p9), %v599_v0  ;;  %548 = vmatprep.mubr.msk.bf16.mxu0 (!%p243_p9), %vm667_vm0, %v666_v1  ;;  %v528_v7 = vld [vmem:[%s831_s2] ss:$0 sm:$0xff] (!%p243_p9)  ;;  %s432_s16 = sld [smem:[#allocation2]] (!%p243_p9)  ;;  %v439_v32 = vand.u32 (!%p243_p9), 127, %v438_v31  ;;  %v441_v33 = vshrl.u32 (!%p243_p9), %v438_v31, 7  ;;  %s271_s17 = sand.u32 (!%p243_p9), 1, %s656_s27  }
  0x12   : > { %546 = vmatprep.subr.bf16.mxu0 (!%p243_p9), %v666_v1  ;;  %554 = vmatprep.mubr.msk.bf16.mxu1 (!%p243_p9), %vm667_vm0, %v666_v1  ;;  %v532_v17 = vld [vmem:[%s833_s4] ss:$0 sm:$0xff] (!%p243_p9)  ;;  %vm452_vm5 = vcmask (!%p243_p9), 122880   ;;  %s455_s24 = scalar_lea.sflag (!%p243_p9), [#allocation4], %s271_s17  ;;  %s668_s25 = smov (!%p243_p9), [#allocation3]  }
  0x13   : > { %553 = vmatpush3.bf16.msra.mxu1 (!%p243_p9), %v601_v6  ;;  %v535_v22 = vld [vmem:[%s834_s5] ss:$0 sm:$0xff] (!%p243_p9)  ;;  %v444_v34 = vadd.s32 (!%p243_p9), 4294967288, %v439_v32  ;;  %v442_v37 = vsub.s32 (!%p243_p9), %v439_v32, %v441_v33  ;;  %s606_s30 = sshll.u32 (!%p243_p9), %s668_s25, 4  ;;  %s607_s30 = int_to_ptr.vmem [resolvable:$false] %s606_s30 }
  0x14   : > { %s608_s9 = scalar_lea.vmem (!%p243_p9), %s607_s30, 32 }
  0x15   : > { %547 = vmatpush3.bf16.msra.mxu0 (!%p243_p9), %v600_v2  ;;  %v447_v39 = vsub.s32 (!%p243_p9), %v444_v34, %v441_v33 }
  0x17   : > { %s844_s18 = smov (!%p274_p10, %s526_s18), 3  ;;  %v433_v35 = vstv %s432_s16 }
  0x18   : > { %s527_s19 = sshll.u32 %s844_s18, 3  ;;  %s536_s18 = sshll.u32 %s733_s6, 4 }
  0x19   : > { %s277_s22 = scalar_lea.vmem %s829_s0, %s527_s19  ;;  %s272_s19 = scalar_lea.vmem [#allocation3], %s271_s17 }
  0x1a   : > { %v280_v3 = vld [vmem:[%s277_s22] sm:$0xff]  ;;  %v281_v4 = vld [vmem:[%s277_s22 + $0x8] sm:$0xff]  ;;  %s467_s20 = sshll.u32 %s272_s19, 4  ;;  %s787_s23 = scalar_lea.hbm %s836_s7, %s536_s18  ;;  %s789_s20 = int_to_ptr.vmem [resolvable:$true] %s467_s20 }
  0x1b   : > { %v282_v5 = vpack.c.bf16 %v281_v4, %v280_v3  ;;  %s602_s6 = scalar_lea.vmem %s789_s20, 16  ;;  %p609_p0 = scmp.lt.s32.totalorder %s789_s20, %s607_s30 }
  0x1c   : > { %p603_p11 = scmp.ne.s32.totalorder %s789_s20, %s602_s6  ;;  %p610_p1 = scmp.lt.s32.totalorder %s608_s9, %s602_s6 }
  0x1d   : > { %549 = vmatmul.mubr.msk.bf16.vlgmr.msra.gmra.mrb[0].mxu0 %vm306_vm1, %v282_v5 }
  0x1e   : > { %p604_p12 = pnand %p603_p11, %p750_p5  ;;  %p611_p2 = por %p610_p1, %p609_p0 }
  0x20   : > { %p605_p13 = pneg %p604_p12 }
  0x22   : > { %p612_p3 = pnand %p611_p2, %p605_p13 }
  0xf0   : > { %v344_v8 = vpop.f32.mrb[0].mxu0 }
  0xf1   : > { %v345_v9 = vadd.f32 %v528_v7, %v344_v8  ;;  %v550_v10 = vpop.f32.mrb[1].mxu0 }
  0xf2   : > { %v347_v11 = vpop.f32.mrb[2].mxu0 }
  0xf3   : > { %v348_v12 = vadd.f32 %v528_v7, %v347_v11  ;;  %v551_v13 = vpop.f32.mrb[3].mxu0  ;;  %v351_v14 = vmax.f32 %v345_v9, 0.0 }
  0xf5   : > { %v352_v15 = vmax.f32 %v348_v12, 0.0 }
  0xf7   : > { %v353_v16 = vpack.c.bf16 %v352_v15, %v351_v14 }
  0xf9   : > { %555 = vmatmul.mubr.msk.bf16.vlgmr.msra.gmra.mrb[0].mxu1 %vm369_vm2, %v353_v16 }
 0x1cc   : > { %v407_v18 = vpop.f32.mrb[0].mxu1 }
 0x1cd   : > { %v408_v19 = vadd.f32 %v532_v17, %v407_v18  ;;  %v556_v20 = vpop.f32.mrb[1].mxu1 }
 0x1ce   : > { %v410_v21 = vpop.f32.mrb[2].mxu1 }
 0x1cf   : > { %v414_v23 = vmax.f32 %v408_v19, 0.0  ;;  %v411_v24 = vadd.f32 %v532_v17, %v410_v21  ;;  %v557_v25 = vpop.f32.mrb[3].mxu1 }
 0x1d1   : > { %v415_v26 = vmax.f32 %v411_v24, 0.0  ;;  %v423_v27 = vmul.f32 %v535_v22, %v414_v23 }
 0x1d3   : > { %v426_v28 = vsel %vm425_vm3, %v423_v27, 0.0  ;;  %v424_v29 = vmul.f32 %v535_v22, %v415_v26 }
 0x1d4   : > { %427 = vadd.xlane.f32.xlu0 %v426_v28 }
 0x1d5   : > { %v429_v30 = vsel %vm425_vm3, %v424_v29, 0.0 }
 0x1d8   : > { %430 = vadd.xlane.f32.xlu0 %v429_v30 }
 0x261   : > { %v428_v36 = vpop.xlane.xlu0 %427 }
 0x262   : > { %v434_v38 = vadd.f32 %v433_v35, %v428_v36 }
 0x264   : > { %v443_v42 = vrot.slane %v434_v38, %v442_v37 }
 0x265   : > { %v431_v40 = vpop.xlane.xlu0 %430 }
 0x266   : > { %v435_v41 = vadd.f32 %v433_v35, %v431_v40 }
 0x268   : > { %v448_v43 = vrot.slane %v435_v41, %v447_v39 }
 0x26a   : > { %v450_v44 = vsel %vm449_vm4, %v448_v43, %v443_v42 }
 0x26b   : > { %453 = vst.msk [vmem:[%s272_s19] sm:$0x1] %vm452_vm5, %v450_v44 }
 0x26c   : > { %615 = shalt.err (!%p612_p3)
}
 0x26d   : > { %s616_s10 = scalar_lea.hbm %s787_s23, 16  ;;  %s620_s16 = scalar_lea.hbm %s836_s7, 32 }
 0x26e   : > { %p617_p4 = scmp.ne.s32.totalorder %s787_s23, %s616_s10  ;;  %p621_p9 = scmp.lt.u32.totalorder %s787_s23, %s836_s7 }
 0x26f   : > { %p622_p10 = scmp.lt.u32.totalorder %s620_s16, %s616_s10  ;;  %p624_p12 = scmp.lt.u32.totalorder %s616_s10, %s787_s23 }
 0x270   : > { %p618_p7 = pnand %p617_p4, %p750_p5 }
 0x271   : > { %p623_p11 = por %p622_p10, %p621_p9 }
 0x272   : > { %p619_p8 = pneg %p618_p7 }
 0x273   : > { %p625_p13 = por %p624_p12, %p623_p11 }
 0x275   : > { %p626_p0 = pnand %p625_p13, %p619_p8 }
 0x277   : > { %629 = shalt.err (!%p626_p0)
}
 0x278   : > { %558 = dma.vmem_to_hbm [thread:$0]  (%p750_p5), %s789_s20, 16, %s787_s23, %s455_s24  }
 0x279 PF: > { %p564_p1 = scmp.ge.s32.totalorder %s664_s29, 2  ;;  %s479_s19 = sand.u32 1, %s652_s26  }
 0x27a   : > { %s480_s21 = scalar_lea.sflag [#allocation4], %s479_s19 }
 0x27b   : > { %p561_p2 = pnand %p564_p1, %p754_p6 }
 0x27d   : > { %647 = dma.done.wait (!%p561_p2), %s480_s21, 16  }
 0x27e   : > { %649 = vsyncadd (!%p561_p2), %s480_s21, 4294967280  ;;  %p18_p3 = scmp.ge.s32.totalorder %s737_s8, 4   ;;  %s839_s26 = smov %s656_s27 }
 0x27f   : > { %s840_s27 = smov %s660_s28  ;;  %s841_s28 = smov %s748_s11 }
 0x280   : > { %s842_s29 = smov %s737_s8  ;;  %20 = sbr.rel (!%p18_p3) target bundleno = 5 (0x5), region = 83 }
 0x287   :  { %484 = vsyncpa [#allocation4], 1 }
 0x288   :  { %486 = vsyncpa [#allocation4 + $0x1], 1 }

</bundles_post_ra>
